<compile_context>
chip_gen: v7x
topology: tpu7x:2x2x1
jax: 0.10.0
libtpu: 0.0.40
codegen_flags: <defaults>
</compile_context>

<pallas_src>
import functools

import jax
import jax.numpy as jnp
from jax.experimental import pallas as pl
from jax.experimental.pallas import tpu as pltpu


def _round_up(x: int, m: int) -> int:
    return ((x + m - 1) // m) * m


def _tabmodel_kernel(xw_ref, xd_ref, ww_ref, w1_ref, b1_ref, wf_ref, bias_ref,
                     out_ref, *, vpu_proj: bool):
    f32 = jnp.float32
    # deeptabular layer 1 — the only real MXU matmul left after host-side folding.
    h = jnp.dot(xd_ref[...], w1_ref[...], preferred_element_type=f32) + b1_ref[...]
    h = jnp.maximum(h, 0.0)

    xw = xw_ref[...].astype(f32)  # elementwise math stays in f32 (v5e-safe)
    if vpu_proj:
        # pred_dim == 1: keep the 1-column projections off the MXU.
        # ww_ref / wf_ref are pre-transposed to (1, F): VPU mul + lane reduce.
        wide = jnp.sum(xw * ww_ref[...], axis=-1, keepdims=True)
        pred = jnp.sum(h * wf_ref[...], axis=-1, keepdims=True)
    else:
        wide = jnp.dot(xw, ww_ref[...], preferred_element_type=f32)
        pred = jnp.dot(h, wf_ref[...], preferred_element_type=f32)

    # wide_out.add_(pred) with all output-side biases merged into one constant.
    out_ref[...] = (wide + pred + bias_ref[...]).astype(out_ref.dtype)


def prepare_tabmodel_params(params, *, weight_dtype=jnp.bfloat16):
    """One-time weight preparation, hoisted out of the per-call path.

      * Algebraic fold of the pred layer into deeptabular layer 2:
          (h @ W2 + b2) @ W3 + b3  ==  h @ (W2 @ W3) + (b2 @ W3 + b3)
        so the kernel keeps a single real MXU matmul (x_deep @ W1).
      * All output-side biases (incl. the wide bias) merged into one constant.
      * pred_dim == 1 projections transposed to (1, F) rows for the VPU path.
      * W1 (the MXU operand) stored in `weight_dtype` (bf16 default) to halve
        its DMA stream; everything elementwise stays f32.
    """
    f32 = jnp.float32
    hi = jax.lax.Precision.HIGHEST
    ww = params["ww"].astype(f32)
    w1 = params["w1"].astype(f32)
    w2 = params["w2"].astype(f32)
    w3 = params["w3"].astype(f32)

    wf = jnp.dot(w2, w3, precision=hi)                                # (hidden, pred_dim)
    bias = (jnp.dot(params["b2"].astype(f32), w3, precision=hi)
            + params["b3"].astype(f32) + params["bw"].astype(f32))    # (1, pred_dim)

    pred_dim = ww.shape[1]
    if pred_dim == 1:
        ww = ww.T   # (1, wide_dim) row for broadcast-multiply on the VPU
        wf = wf.T   # (1, hidden)

    return {
        "ww": ww,                                # f32 (VPU / elementwise operand)
        "w1": w1.astype(weight_dtype),           # MXU operand (bf16 default)
        "b1": params["b1"].astype(f32),          # (1, hidden), f32
        "wf": wf,                                # f32
        "bias": bias,                            # (1, pred_dim), f32
    }


@functools.partial(jax.jit, static_argnames=("batch_tile",))
def tabmodel_forward(x_wide, x_deep, prepared, *, batch_tile: int = 2048):
    """Fused TabModel forward. Returns (B, pred_dim) float32.

    Activations are consumed in whatever dtype the caller stores them in
    (bf16 recommended for bandwidth); no wrapper-side pad/cast passes.
    """
    B, wide_dim = x_wide.shape
    _, deep_dim = x_deep.shape
    pred_dim = prepared["bias"].shape[1]
    vpu_proj = (pred_dim == 1)

    # Keep the MXU operand dtypes homogeneous (only casts on a mismatch).
    if x_deep.dtype != prepared["w1"].dtype:
        x_deep = x_deep.astype(prepared["w1"].dtype)

    # Batch tile: large enough to amortize the ~0.35us/step overhead, but
    # capped at ceil(B/2) so any non-trivial batch gives >= 2 grid steps and
    # the "parallel" axis can land on both v7x TensorCores.
    # TODO(synk): per-generation tile sweep (v5e/v6e 128MiB VMEM can take 4096-8192).
    TB = min(batch_tile, max(8, _round_up((B + 1) // 2, 8)))
    num_tiles = pl.cdiv(B, TB)   # ragged last block: edge rows are masked on writeback

    batch_spec = lambda cols: pl.BlockSpec((TB, cols), lambda i: (i, 0))
    const_spec = lambda a: pl.BlockSpec(a.shape, lambda i: (0, 0))  # resident, no re-DMA

    kernel = functools.partial(_tabmodel_kernel, vpu_proj=vpu_proj)

    # TODO(synk): pred_dim==1 output blocks are width-1 (masked vst); a lane-packed
    # (TB//128, 128) output layout would help only at very large B since output
    # bytes are ~4/row vs ~100/row of input — skipped to keep the store path simple.
    out = pl.pallas_call(
        kernel,
        out_shape=jax.ShapeDtypeStruct((B, pred_dim), jnp.float32),
        grid=(num_tiles,),
        in_specs=[
            batch_spec(wide_dim),          # x_wide tile, unpadded lanes
            batch_spec(deep_dim),          # x_deep tile, unpadded lanes
            const_spec(prepared["ww"]),
            const_spec(prepared["w1"]),
            const_spec(prepared["b1"]),
            const_spec(prepared["wf"]),
            const_spec(prepared["bias"]),
        ],
        out_specs=pl.BlockSpec((TB, pred_dim), lambda i: (i, 0)),
        compiler_params=pltpu.CompilerParams(
            dimension_semantics=("parallel",),   # shard batch tiles across TCs (v7x)
        ),
    )(x_wide, x_deep, prepared["ww"], prepared["w1"], prepared["b1"],
      prepared["wf"], prepared["bias"])

    return out


def _reference(x_wide, x_deep, p):
    hi = jax.lax.Precision.HIGHEST
    wide_out = jnp.dot(x_wide, p["ww"], precision=hi) + p["bw"]
    h = jnp.maximum(jnp.dot(x_deep, p["w1"], precision=hi) + p["b1"], 0.0)
    d = jnp.dot(h, p["w2"], precision=hi) + p["b2"]
    pred = jnp.dot(d, p["w3"], precision=hi) + p["b3"]
    return wide_out + pred


if __name__ == "__main__":
    # Small shapes consistent with the tabular model forward.
    B = 8          # batch
    WIDE_DIM = 16  # wide (one-hot / crossed) feature dim
    DEEP_DIM = 32  # deeptabular input feature dim
    HIDDEN = 64    # deeptabular hidden width
    OUT_DIM = 32   # deeptabular.output_dim
    PRED_DIM = 1   # pred_dim

    key = jax.random.PRNGKey(0)
    keys = jax.random.split(key, 8)

    x_wide = jax.random.normal(keys[0], (B, WIDE_DIM), dtype=jnp.float32)
    x_deep = jax.random.normal(keys[1], (B, DEEP_DIM), dtype=jnp.float32)

    def init_linear(k, fan_in, fan_out):
        lim = 1.0 / jnp.sqrt(jnp.float32(fan_in))
        kw, kb = jax.random.split(k)
        w = jax.random.uniform(kw, (fan_in, fan_out), jnp.float32, -lim, lim)
        b = jax.random.uniform(kb, (1, fan_out), jnp.float32, -lim, lim)
        return w, b

    ww, bw = init_linear(keys[2], WIDE_DIM, PRED_DIM)
    w1, b1 = init_linear(keys[3], DEEP_DIM, HIDDEN)
    w2, b2 = init_linear(keys[4], HIDDEN, OUT_DIM)
    w3, b3 = init_linear(keys[5], OUT_DIM, PRED_DIM)
    params = dict(ww=ww, bw=bw, w1=w1, b1=b1, w2=w2, b2=b2, w3=w3, b3=b3)

    # One-time weight prep (folding / transposes / dtype), reused across calls.
    prep_f32 = prepare_tabmodel_params(params, weight_dtype=jnp.float32)
    prep_bf16 = prepare_tabmodel_params(params)   # bf16 storage (default)

    ref = _reference(x_wide, x_deep, params)

    # --- small batch, f32 storage: tight tolerance ---
    out = jax.block_until_ready(tabmodel_forward(x_wide, x_deep, prep_f32))
    assert out.shape == (B, PRED_DIM)
    assert jnp.allclose(out, ref, atol=1e-4, rtol=1e-4)

    # --- small batch, bf16 HBM storage for activations + W1 (f32 accumulation) ---
    out_bf16 = jax.block_until_ready(
        tabmodel_forward(x_wide.astype(jnp.bfloat16),
                         x_deep.astype(jnp.bfloat16), prep_bf16))
    assert jnp.allclose(out_bf16, ref, atol=1e-1, rtol=5e-2)

    # --- larger batch: multi-tile grid + ragged last block (no batch padding) ---
    B2 = 1200
    xw2 = jax.random.normal(keys[6], (B2, WIDE_DIM), dtype=jnp.float32)
    xd2 = jax.random.normal(keys[7], (B2, DEEP_DIM), dtype=jnp.float32)
    ref2 = _reference(xw2, xd2, params)

    out2 = jax.block_until_ready(
        tabmodel_forward(xw2, xd2, prep_f32, batch_tile=512))
    assert out2.shape == (B2, PRED_DIM)
    assert jnp.allclose(out2, ref2, atol=1e-4, rtol=1e-4)

    out3 = jax.block_until_ready(
        tabmodel_forward(xw2.astype(jnp.bfloat16), xd2.astype(jnp.bfloat16),
                         prep_bf16, batch_tile=512))
    assert jnp.allclose(out3, ref2, atol=1e-1, rtol=5e-2)

    # TODO(synk): head_dropout / head_batchnorm (training-mode ops) and the
    # TabNet M_loss branch are not exercised by this inference-path config.
    print("KERNEL_OK")
</pallas_src>

<mosaic_0001>
module attributes {stable_mosaic.version = 11 : i64} {
  func.func @_tabmodel_kernel(%arg0: i32, %arg1: memref<8x16xf32, #tpu.memory_space<vmem>>, %arg2: memref<8x32xf32, #tpu.memory_space<vmem>>, %arg3: memref<1x16xf32, #tpu.memory_space<vmem>>, %arg4: memref<32x64xf32, #tpu.memory_space<vmem>>, %arg5: memref<1x64xf32, #tpu.memory_space<vmem>>, %arg6: memref<1x64xf32, #tpu.memory_space<vmem>>, %arg7: memref<1x1xf32, #tpu.memory_space<vmem>>, %arg8: memref<8x1xf32, #tpu.memory_space<vmem>>) attributes {dimension_semantics = [#tpu.dimension_semantics<parallel>], iteration_bounds = array<i64: 1>, scalar_prefetch = 0 : i64, scratch_operands = 0 : i64, tpu.core_type = #tpu.core_type<tc>, window_params = [{transform_indices = @transform_0, window_bounds = array<i64: 8, 16>}, {transform_indices = @transform_1, window_bounds = array<i64: 8, 32>}, {pipeline_mode = #tpu.pipeline_mode<synchronous>, transform_indices = @transform_2, window_bounds = array<i64: 1, 16>}, {pipeline_mode = #tpu.pipeline_mode<synchronous>, transform_indices = @transform_3, window_bounds = array<i64: 32, 64>}, {pipeline_mode = #tpu.pipeline_mode<synchronous>, transform_indices = @transform_4, window_bounds = array<i64: 1, 64>}, {pipeline_mode = #tpu.pipeline_mode<synchronous>, transform_indices = @transform_5, window_bounds = array<i64: 1, 64>}, {pipeline_mode = #tpu.pipeline_mode<synchronous>, transform_indices = @transform_6, window_bounds = array<i64: 1, 1>}, {transform_indices = @transform_7, window_bounds = array<i64: 8, 1>}]} {
    %c0 = arith.constant 0 : index
    %c0_0 = arith.constant 0 : index
    %0 = vector.load %arg2[%c0, %c0_0] : memref<8x32xf32, #tpu.memory_space<vmem>>, vector<8x32xf32>
    %c0_1 = arith.constant 0 : index
    %c0_2 = arith.constant 0 : index
    %1 = vector.load %arg4[%c0_1, %c0_2] : memref<32x64xf32, #tpu.memory_space<vmem>>, vector<32x64xf32>
    %cst = arith.constant dense<0.000000e+00> : vector<8x64xf32>
    %2 = tpu.matmul %0, %1, %cst {dimension_numbers = #tpu.dot_dimension_numbers<[1], [0], [0], [1], [0, 0, 1, 1], [], []>} : vector<8x32xf32>, vector<32x64xf32>, vector<8x64xf32> -> vector<8x64xf32>
    %c0_3 = arith.constant 0 : index
    %c0_4 = arith.constant 0 : index
    %3 = vector.load %arg5[%c0_3, %c0_4] : memref<1x64xf32, #tpu.memory_space<vmem>>, vector<1x64xf32>
    %4 = vector.broadcast %3 : vector<1x64xf32> to vector<8x64xf32>
    %5 = arith.addf %2, %4 : vector<8x64xf32>
    %cst_5 = arith.constant 0.000000e+00 : f32
    %6 = vector.broadcast %cst_5 : f32 to vector<8x64xf32>
    %7 = arith.maximumf %5, %6 : vector<8x64xf32>
    %c0_6 = arith.constant 0 : index
    %c0_7 = arith.constant 0 : index
    %8 = vector.load %arg1[%c0_6, %c0_7] : memref<8x16xf32, #tpu.memory_space<vmem>>, vector<8x16xf32>
    %c0_8 = arith.constant 0 : index
    %c0_9 = arith.constant 0 : index
    %9 = vector.load %arg3[%c0_8, %c0_9] : memref<1x16xf32, #tpu.memory_space<vmem>>, vector<1x16xf32>
    %10 = vector.broadcast %9 : vector<1x16xf32> to vector<8x16xf32>
    %11 = arith.mulf %8, %10 : vector<8x16xf32>
    %cst_10 = arith.constant dense<0.000000e+00> : vector<8xf32>
    %12 = vector.multi_reduction <add>, %11, %cst_10 [1] : vector<8x16xf32> to vector<8xf32>
    %13 = vector.shape_cast %12 : vector<8xf32> to vector<8x1xf32>
    %c0_11 = arith.constant 0 : index
    %c0_12 = arith.constant 0 : index
    %14 = vector.load %arg6[%c0_11, %c0_12] : memref<1x64xf32, #tpu.memory_space<vmem>>, vector<1x64xf32>
    %15 = vector.broadcast %14 : vector<1x64xf32> to vector<8x64xf32>
    %16 = arith.mulf %7, %15 : vector<8x64xf32>
    %cst_13 = arith.constant dense<0.000000e+00> : vector<8xf32>
    %17 = vector.multi_reduction <add>, %16, %cst_13 [1] : vector<8x64xf32> to vector<8xf32>
    %18 = vector.shape_cast %17 : vector<8xf32> to vector<8x1xf32>
    %19 = arith.addf %13, %18 : vector<8x1xf32>
    %c0_14 = arith.constant 0 : index
    %c0_15 = arith.constant 0 : index
    %20 = vector.load %arg7[%c0_14, %c0_15] : memref<1x1xf32, #tpu.memory_space<vmem>>, vector<1x1xf32>
    %21 = vector.broadcast %20 : vector<1x1xf32> to vector<8x1xf32>
    %22 = arith.addf %19, %21 : vector<8x1xf32>
    %c0_16 = arith.constant 0 : index
    %c0_17 = arith.constant 0 : index
    %23 = vector.load %arg8[%c0_16, %c0_17] : memref<8x1xf32, #tpu.memory_space<vmem>>, vector<8x1xf32>
    tpu.vector_store %arg8[%c0_16, %c0_17], %22 {strides = array<i32>} : memref<8x1xf32, #tpu.memory_space<vmem>>, vector<8x1xf32>,
    return
  }
  func.func @transform_0(%arg0: i32) -> (i32, i32) {
    %c0_i32 = arith.constant 0 : i32
    %c0_i32_0 = arith.constant 0 : i32
    return %arg0, %c0_i32 : i32, i32
  }
  func.func @transform_1(%arg0: i32) -> (i32, i32) {
    %c0_i32 = arith.constant 0 : i32
    %c0_i32_0 = arith.constant 0 : i32
    return %arg0, %c0_i32 : i32, i32
  }
  func.func @transform_2(%arg0: i32) -> (i32, i32) {
    %c0_i32 = arith.constant 0 : i32
    %c0_i32_0 = arith.constant 0 : i32
    %c0_i32_1 = arith.constant 0 : i32
    return %c0_i32, %c0_i32_0 : i32, i32
  }
  func.func @transform_3(%arg0: i32) -> (i32, i32) {
    %c0_i32 = arith.constant 0 : i32
    %c0_i32_0 = arith.constant 0 : i32
    %c0_i32_1 = arith.constant 0 : i32
    return %c0_i32, %c0_i32_0 : i32, i32
  }
  func.func @transform_4(%arg0: i32) -> (i32, i32) {
    %c0_i32 = arith.constant 0 : i32
    %c0_i32_0 = arith.constant 0 : i32
    %c0_i32_1 = arith.constant 0 : i32
    return %c0_i32, %c0_i32_0 : i32, i32
  }
  func.func @transform_5(%arg0: i32) -> (i32, i32) {
    %c0_i32 = arith.constant 0 : i32
    %c0_i32_0 = arith.constant 0 : i32
    %c0_i32_1 = arith.constant 0 : i32
    return %c0_i32, %c0_i32_0 : i32, i32
  }
  func.func @transform_6(%arg0: i32) -> (i32, i32) {
    %c0_i32 = arith.constant 0 : i32
    %c0_i32_0 = arith.constant 0 : i32
    %c0_i32_1 = arith.constant 0 : i32
    return %c0_i32, %c0_i32_0 : i32, i32
  }
  func.func @transform_7(%arg0: i32) -> (i32, i32) {
    %c0_i32 = arith.constant 0 : i32
    %c0_i32_0 = arith.constant 0 : i32
    return %arg0, %c0_i32 : i32, i32
  }
}

</mosaic_0001>

<bundles_post_ra>
// kernel: tabmodel_forward.1
= control target key start
LH: loop header
LB: loop body
LE: loop exit
PB: predicated region body
PF: predicated region fallthrough
CT: control target
= control target key end

     0   :  { %s398_s0 = inlined_call_operand.hbm [shape: f32[8,16], index: 0, kind: input, shape index: {}]   ;;  %s399_s1 = inlined_call_operand.hbm [shape: f32[8,32], index: 1, kind: input, shape index: {}]   ;;  %s400_s2 = inlined_call_operand.vmem [shape: f32[1,16], index: 2, kind: input, shape index: {}]   ;;  %s401_s3 = inlined_call_operand.hbm [shape: f32[32,64], index: 3, kind: input, shape index: {}]   ;;  %s402_s4 = inlined_call_operand.vmem [shape: f32[1,64], index: 4, kind: input, shape index: {}]   ;;  %s403_s5 = inlined_call_operand.vmem [shape: f32[1,64], index: 5, kind: input, shape index: {}]   ;;  %s404_s6 = inlined_call_operand.<no memory space> [shape: f32[1,1], index: 6, kind: input, shape index: {}]   ;;  %s405_s7 = inlined_call_operand.vmem [shape: f32[8,1], index: 7, kind: output, shape index: {}]  }
   0x1   :  { %v12_v0 = vstv %s404_s6 }
   0x2   :  { %13 = vst [vmem:[#allocation2] sm:$0x1] %v12_v0 }
   0x3   :  { %14 = vsyncpa [#allocation4], 0 }
   0x4   :  { %15 = vsyncpa [#allocation6], 0  ;;  %s299_s26 = smov [#allocation5]   ;;  %s300_s28 = smov [#allocation3]  }
   0x5   :  { %s32_s27 = sshll.u32 %s299_s26, 4  ;;  %s22_s29 = sshll.u32 %s300_s28, 4  ;;  %s33_s27 = int_to_ptr.vmem [resolvable:$true] %s32_s27  ;;  %s23_s29 = int_to_ptr.vmem [resolvable:$true] %s22_s29 }
   0x6   :  { %s229_s9 = scalar_lea.hbm %s399_s1, 128 }
   0x7   :  { %p230_p0 = scmp.ne.s32.totalorder %s399_s1, %s229_s9  ;;  %p233_p1 = scmp.lt.u32.totalorder %s229_s9, %s399_s1 }
   0x9   :  { %p235_p2 = pnand %p233_p1, %p230_p0 }
   0xb   :  { %238 = shalt.err (!%p235_p2)
}
   0xc   :  { %s239_s6 = scalar_lea.vmem %s33_s27, 128  ;;  %p244_p4 = scmp.lt.s32.totalorder %s33_s27, %s33_s27 }
   0xd   :  { %p240_p3 = scmp.ne.s32.totalorder %s33_s27, %s239_s6  ;;  %p245_p5 = scmp.lt.s32.totalorder %s239_s6, %s239_s6 }
   0xf   :  { %p246_p6 = por %p245_p5, %p244_p4 }
  0x11   :  { %p247_p7 = pnand %p246_p6, %p240_p3 }
  0x13   :  { %250 = shalt.err (!%p247_p7)
}
  0x14   :  { %35 = dma.hbm_to_vmem [thread:$0]  %s399_s1, 128, %s33_s27, [#allocation6]  }
  0x15   :  { %s251_s18 = scalar_lea.hbm %s398_s0, 128 }
  0x16   :  { %p252_p8 = scmp.ne.s32.totalorder %s398_s0, %s251_s18  ;;  %p255_p9 = scmp.lt.u32.totalorder %s251_s18, %s398_s0 }
  0x18   :  { %p257_p10 = pnand %p255_p9, %p252_p8 }
  0x1a   :  { %260 = shalt.err (!%p257_p10)
}
  0x1b   :  { %s261_s23 = scalar_lea.vmem %s23_s29, 128  ;;  %p266_p12 = scmp.lt.s32.totalorder %s23_s29, %s23_s29 }
  0x1c   :  { %p262_p11 = scmp.ne.s32.totalorder %s23_s29, %s261_s23  ;;  %p267_p13 = scmp.lt.s32.totalorder %s261_s23, %s261_s23 }
  0x1e   :  { %p268_p0 = por %p267_p13, %p266_p12 }
  0x20   :  { %p269_p1 = pnand %p268_p0, %p262_p11 }
  0x22   :  { %272 = shalt.err (!%p269_p1)
}
  0x23   :  { %25 = dma.hbm_to_vmem [thread:$0]  %s398_s0, 128, %s23_s29, [#allocation4]  }
  0x24   :  { %s301_s25 = smov [#allocation7]   ;;  %s273_s30 = scalar_lea.hbm %s401_s3, 512 }
  0x25   :  { %s43_s26 = sshll.u32 %s301_s25, 4  ;;  %p274_p2 = scmp.ne.s32.totalorder %s401_s3, %s273_s30  ;;  %s44_s26 = int_to_ptr.vmem [resolvable:$true] %s43_s26 }
  0x26   :  { %p277_p3 = scmp.lt.u32.totalorder %s273_s30, %s401_s3 }
  0x28   :  { %p279_p4 = pnand %p277_p3, %p274_p2 }
  0x2a   :  { %282 = shalt.err (!%p279_p4)
}
  0x2b   :  { %s283_s12 = scalar_lea.vmem %s44_s26, 512  ;;  %p288_p6 = scmp.lt.s32.totalorder %s44_s26, %s44_s26 }
  0x2c   :  { %p284_p5 = scmp.ne.s32.totalorder %s44_s26, %s283_s12  ;;  %p289_p7 = scmp.lt.s32.totalorder %s283_s12, %s283_s12 }
  0x2e   :  { %p290_p8 = por %p289_p7, %p288_p6 }
  0x30   :  { %p291_p9 = pnand %p290_p8, %p284_p5 }
  0x32   :  { %294 = shalt.err (!%p291_p9)
}
  0x33   :  { %s302_s0 = smov 128   ;;  %s303_s29 = smov 8  }
  0x34   :  { %49 = dma.hbm_to_vmem [thread:$0]  %s401_s3, 512, %s44_s26, [#allocation6], %s302_s0, %s302_s0, %s303_s29  }
  0x35   :  { %295 = dma.done.wait [#allocation4], 128  }
  0x36   :  { %296 = vsyncadd [#allocation4], 4294967168 }
  0x37   :  { %297 = dma.done.wait [#allocation6], 640  }
  0x38   :  { %298 = vsyncadd [#allocation6], 4294966656  ;;  %v304_v1 = vmov 0.0|0.0   ;;  %vm305_vm0 = vmmov 0   ;;  %v306_v2 = vmov 0.0   ;;  %v66_v3 = vld [vmem:[#allocation7] sm:$0xff] }
  0x39   :  { %215 = vmatprep.subr.bf16.mxu0 %v304_v1  ;;  %212 = vmatprep.mubr.msk.f32.mxu0 %vm305_vm0, %v306_v2  ;;  %v67_v4 = vld [vmem:[#allocation7 + $0x8] sm:$0xff]  ;;  %v68_v5 = vld [vmem:[#allocation7 + $0x10] sm:$0xff]  ;;  %v69_v7 = vld [vmem:[#allocation7 + $0x18] sm:$0xff]  ;;  %vm77_vm1 = vcmask 261120   ;;  %vm161_vm2 = vcmask 130048   ;;  %vm173_vm3 = vcmask 523264  }
  0x3a   :  { %v216_v6 = vpack.c.bf16 %v67_v4, %v66_v3  ;;  %v219_v8 = vpack.c.bf16 %v69_v7, %v68_v5  ;;  %v65_v9 = vld [vmem:[#allocation5] sm:$0xff]  ;;  %v152_v10 = vld [vmem:[#allocation3] sm:$0xff]  ;;  %v196_v11 = vld [vmem:[%s400_s2] ss:$0 sm:$0xff]  ;;  %vm186_vm4 = vcmask 7168  }
  0x3b   :  { %v160_v12 = vmul.f32 %v196_v11, %v152_v10  ;;  %v194_v14 = vld [vmem:[%s402_s4] ss:$0 sm:$0xff] }
  0x3c   :  { %217 = vmatpush3.bf16.msra.mxu0 %v216_v6  ;;  %v197_v18 = vld [vmem:[%s403_s5] ss:$0 sm:$0xff] }
  0x3d   :  { %218 = vmatprep.subr.bf16.mxu0 %v304_v1  ;;  %v162_v13 = vsel %vm161_vm2, %v160_v12, 0.0  ;;  %v198_v23 = vld [vmem:[#allocation2] ss:$0 sm:$0xff] }
  0x3e   :  { %163 = vadd.xlane.f32.xlu0 %v162_v13 }
  0x40   :  { %220 = vmatpush3.bf16.msra.mxu0 %v219_v8 }
  0x43   :  { %213 = vmatmul.mubr.msk.f32.vlgmr.msra.gmra.mrb[0].mxu0 %vm77_vm1, %v65_v9 }
  0xcb   :  { %v164_v22 = vpop.xlane.xlu0 %163 }
 0x116   :  { %v147_v15 = vpop.f32.mrb[0].mxu0 }
 0x117   :  { %v148_v16 = vadd.f32 %v194_v14, %v147_v15  ;;  %v214_v17 = vpop.f32.mrb[1].mxu0 }
 0x119   :  { %v151_v19 = vmax.f32 %v148_v16, 0.0 }
 0x11b   :  { %v172_v20 = vmul.f32 %v197_v18, %v151_v19 }
 0x11d   :  { %v174_v21 = vsel %vm173_vm3, %v172_v20, 0.0 }
 0x11e   :  { %175 = vadd.xlane.f32.xlu0 %v174_v21 }
 0x1ab   :  { %v176_v24 = vpop.xlane.xlu0 %175 }
 0x1ac   :  { %v177_v25 = vadd.f32 %v176_v24, %v164_v22 }
 0x1ae   :  { %v185_v26 = vadd.f32 %v198_v23, %v177_v25 }
 0x1b0   :  { %187 = vst.msk [vmem:[%s405_s7] sm:$0xff] %vm186_vm4, %v185_v26 }
 0x1b1   :  { %192 = vsyncpa [#allocation4], 1 }
 0x1b2   :  { %193 = vsyncpa [#allocation6], 1 }

</bundles_post_ra>
